<compile_context>
chip_gen: v7x
topology: tpu7x:2x2x1
jax: 0.10.0
libtpu: 0.0.40
codegen_flags: <defaults>
</compile_context>

<pallas_src>
import functools

import jax
import jax.numpy as jnp
from jax.experimental import pallas as pl
from jax.experimental.pallas import tpu as pltpu

_LANE = 128  # TPU lane width; all channel/feature dims padded to this.


# ---------------------------------------------------------------------------
# Fused Pallas kernel: conv1 + conv2 + conv3 + flatten + dueling-head MLP.
# ---------------------------------------------------------------------------
def _fused_dueling_cnn_kernel(p1_ref, w1_ref, b1_ref, w2_ref, b2_ref,
                              w3_ref, b3_ref, f1_ref, fb1_ref, f2_ref, fb2_ref,
                              head_ref, *, bblk, gh, gw, h2, w2, h3, w3):
    f32, bf16 = jnp.float32, jnp.bfloat16
    cpad = w1_ref.shape[1]                       # 128 = 4 phases x 32 channels

    # ---- conv1 + ReLU (phase packed): one bf16 MXU matmul, f32 accum -------
    # Output row (b, y, x) holds lanes [q*32+c] = conv1 channel c at spatial
    # position (2y + q//2, 2x + q%2)  -> 128 dense lanes, conv2-ready.
    p1 = p1_ref[0]                               # (bblk*gh*gw, 4*K1) bf16
    a1 = jnp.dot(p1, w1_ref[...], preferred_element_type=f32)
    a1 = jnp.maximum(a1 + b1_ref[...], 0.0)      # (bblk*gh*gw, 128) f32
    a1g = a1.astype(bf16).reshape(bblk, gh, gw, cpad)

    # ---- conv2 (4x4, stride 2) + ReLU: 4 dense tap groups folded to K=512 --
    wins = [a1g[:, di:di + h2, dj:dj + w2, :] for di in (0, 1) for dj in (0, 1)]
    op2 = jnp.concatenate(wins, axis=-1).reshape(bblk * h2 * w2, 4 * cpad)
    a2 = jnp.dot(op2, w2_ref[...], preferred_element_type=f32)
    a2 = jnp.maximum(a2 + b2_ref[...], 0.0)      # (bblk*h2*w2, 128) f32
    a2g = a2.astype(bf16).reshape(bblk, h2, w2, cpad)

    # ---- conv3 (3x3, stride 1) + ReLU: 9 taps folded to one K=1152 matmul --
    wins = [a2g[:, i:i + h3, j:j + w3, :] for i in range(3) for j in range(3)]
    op3 = jnp.concatenate(wins, axis=-1).reshape(bblk * h3 * w3, 9 * cpad)
    a3 = jnp.dot(op3, w3_ref[...], preferred_element_type=f32)
    a3 = jnp.maximum(a3 + b3_ref[...], 0.0)      # (bblk*h3*w3, 128) f32

    # ---- flatten (NHWC order) + dueling head MLP ----------------------------
    feat = a3.astype(bf16).reshape(bblk, h3 * w3 * cpad)
    hid = jnp.dot(feat, f1_ref[...], preferred_element_type=f32) + fb1_ref[...]
    hid = jnp.maximum(hid, 0.0).astype(bf16)
    head = jnp.dot(hid, f2_ref[...], preferred_element_type=f32) + fb2_ref[...]
    head_ref[0] = head.astype(head_ref.dtype)


def _fused_forward(patches, kp, *, batch, bblk, gh, gw, h2, w2, h3, w3):
    nb, rows_blk, kdim = patches.shape
    cpad = kp["w1"].shape[1]
    hpad = kp["f1"].shape[1]
    apad = kp["f2"].shape[1]

    kern = functools.partial(_fused_dueling_cnn_kernel, bblk=bblk, gh=gh,
                             gw=gw, h2=h2, w2=w2, h3=h3, w3=w3)

    # Real (unpadded) flop count; the tiny FC head uses padded dims (negligible).
    c1out = cpad // 4            # 32 real conv1 channels (4 packed per 128 lanes)
    c_real = cpad // 2           # 64 real conv2/conv3 channels
    k1 = kdim // 4               # real conv1 patch length (kh*kw*Cin)
    flops = 2 * batch * (4 * gh * gw * k1 * c1out
                         + h2 * w2 * 16 * c1out * c_real
                         + h3 * w3 * 9 * c_real * c_real
                         + h3 * w3 * c_real * hpad
                         + hpad * apad)
    bytes_accessed = (int(patches.size) * patches.dtype.itemsize
                      + sum(int(v.size) * v.dtype.itemsize for v in kp.values())
                      + batch * apad * 4)

    grid_spec = pltpu.PrefetchScalarGridSpec(
        num_scalar_prefetch=0,
        grid=(nb,),
        in_specs=[
            # Patch block: last two dims equal the full array dims (always legal).
            pl.BlockSpec((1, rows_blk, kdim), lambda i: (i, 0, 0)),
            # Weights/biases: constant index maps -> fetched once, stay in VMEM.
            # TODO(synk): pipeline_mode=pl.Buffered(1) here for VMEM headroom.
            pl.BlockSpec(kp["w1"].shape, lambda i: (0, 0)),
            pl.BlockSpec(kp["b1"].shape, lambda i: (0, 0)),
            pl.BlockSpec(kp["w2"].shape, lambda i: (0, 0)),
            pl.BlockSpec(kp["b2"].shape, lambda i: (0, 0)),
            pl.BlockSpec(kp["w3"].shape, lambda i: (0, 0)),
            pl.BlockSpec(kp["b3"].shape, lambda i: (0, 0)),
            pl.BlockSpec(kp["f1"].shape, lambda i: (0, 0)),
            pl.BlockSpec(kp["fb1"].shape, lambda i: (0, 0)),
            pl.BlockSpec(kp["f2"].shape, lambda i: (0, 0)),
            pl.BlockSpec(kp["fb2"].shape, lambda i: (0, 0)),
        ],
        out_specs=pl.BlockSpec((1, bblk, apad), lambda i: (i, 0, 0)),
    )

    return pl.pallas_call(
        kern,
        out_shape=jax.ShapeDtypeStruct((nb, bblk, apad), jnp.float32),
        grid_spec=grid_spec,
        compiler_params=pltpu.CompilerParams(
            dimension_semantics=("parallel",),
            vmem_limit_bytes=48 * 1024 * 1024),   # explicit budget, < v7x 64 MiB
        cost_estimate=pl.CostEstimate(flops=int(flops), transcendentals=0,
                                      bytes_accessed=int(bytes_accessed)),
    )(patches, kp["w1"], kp["b1"], kp["w2"], kp["b2"], kp["w3"], kp["b3"],
      kp["f1"], kp["fb1"], kp["f2"], kp["fb2"])


# ---------------------------------------------------------------------------
# JAX glue
# ---------------------------------------------------------------------------
def _conv1_patches_phase_packed(x_nhwc, kh, kw, stride):
    """Phase-PACKED im2col for conv1 (VALID), done once on the HBM input.

    Row (b, y, x) holds the 4 phase patches concatenated:
    [patch@(2y,2x) | patch@(2y,2x+1) | patch@(2y+1,2x) | patch@(2y+1,2x+1)],
    each patch in (kh, kw, C) feature order -> K = 4*kh*kw*C.  Matmul with the
    block-diagonal conv1 weight yields 4 phase positions x 32 channels = 128
    dense output lanes per row, which is exactly conv2's packed input layout.
    # TODO(synk): move this extraction in-kernel (strided ref reads) to avoid
    # materializing the ~3x patch expansion in HBM (biggest win on v5e).
    """
    b, hgt, wid, c = x_nhwc.shape
    h1 = (hgt - kh) // stride + 1
    w1 = (wid - kw) // stride + 1
    assert h1 % 2 == 0 and w1 % 2 == 0, "conv1 output must be even"
    gh, gw = h1 // 2, w1 // 2
    k1 = kh * kw * c
    cols = []
    for i in range(kh):
        for j in range(kw):
            cols.append(x_nhwc[:, i:i + stride * (h1 - 1) + 1:stride,
                               j:j + stride * (w1 - 1) + 1:stride, :])
    p = jnp.stack(cols, axis=3)                   # (B, h1, w1, kh*kw, C)
    p = p.reshape(b, gh, 2, gw, 2, k1)            # [b, y, pi, x, pj, K1]
    p = p.transpose(0, 1, 3, 2, 4, 5)             # [b, y, x, pi, pj, K1]
    return p.reshape(b * gh * gw, 4 * k1), h1, w1


def _round_up(n, m):
    return ((n + m - 1) // m) * m


def _pad_axis(a, axis, size):
    if a.shape[axis] == size:
        return a
    widths = [(0, 0)] * a.ndim
    widths[axis] = (0, size - a.shape[axis])
    return jnp.pad(a, widths)


def _pick_bblk(batch):
    """Largest divisor of batch <= 8 that still leaves >= 2 grid steps
    (so the 'parallel' axis can shard across v7x's 2 TCs and the patch DMA
    can pipeline); falls back to 1 block only when batch == 1."""
    best = 1
    for b in range(1, min(batch, 8) + 1):
        if batch % b == 0 and (batch // b >= 2 or batch == 1):
            best = b
    return best


def prepare_params(p):
    """One-time conversion of PyTorch-layout params to the kernel layout.
    All matmul weights are stored bf16 (MXU-native); biases stay f32 and are
    added in the f32 accumulation domain."""
    f32, bf16 = jnp.float32, jnp.bfloat16
    cpad = _LANE
    cout1 = p["c1_w"].shape[0]                    # 32
    assert 4 * cout1 == cpad, "conv1 must have 32 output channels"
    cin = p["c1_w"].shape[1]
    k1 = 8 * 8 * cin

    # conv1: matmul form (feature order kh,kw,Cin) then block-diagonal phase
    # packing -> one matmul row produces 4 phase positions x 32 ch = 128 lanes.
    w1 = jnp.transpose(p["c1_w"], (2, 3, 1, 0)).reshape(k1, cout1)
    w1p = jnp.zeros((4 * k1, cpad), f32)
    for q in range(4):
        w1p = w1p.at[q * k1:(q + 1) * k1, q * cout1:(q + 1) * cout1].set(w1)
    b1p = jnp.tile(p["c1_b"], 4).reshape(1, cpad)

    # conv2: 4 dense tap groups (one per 2x2 grid offset (di,dj)); each group
    # stacks the 4 phases' (32,64) taps into 128 fully-real K lanes -> (512,128).
    w2t = jnp.transpose(p["c2_w"], (2, 3, 1, 0))  # (4,4,32,64) = (kh,kw,Cin,Cout)
    blocks = [w2t[2 * di + pi, 2 * dj + pj]
              for di in (0, 1) for dj in (0, 1)
              for pi in (0, 1) for pj in (0, 1)]
    w2p = _pad_axis(jnp.concatenate(blocks, axis=0), 1, cpad)      # (512, 128)
    b2p = _pad_axis(p["c2_b"], 0, cpad).reshape(1, cpad)

    # conv3: fold the 9 taps along K (channels zero-padded to 128) -> (1152,128).
    w3t = jnp.transpose(p["c3_w"], (2, 3, 1, 0))  # (3,3,64,64)
    w3p = _pad_axis(_pad_axis(w3t, 2, cpad), 3, cpad).reshape(9 * cpad, cpad)
    b3p = _pad_axis(p["c3_b"], 0, cpad).reshape(1, cpad)

    hidden = p["fc1_w"].shape[1]
    n_act = p["fc2_w"].shape[1]
    hpad = _round_up(hidden, _LANE)
    apad = _round_up(n_act, _LANE)
    c3 = p["c3_w"].shape[0]
    hw3 = p["fc1_w"].shape[0] // c3
    f1 = p["fc1_w"].reshape(hw3, c3, hidden)      # NHWC-flat feature order
    f1 = _pad_axis(f1, 1, cpad).reshape(hw3 * cpad, hidden)
    f1 = _pad_axis(f1, 1, hpad)
    f2 = _pad_axis(_pad_axis(p["fc2_w"], 0, hpad), 1, apad)

    return {
        "w1": w1p.astype(bf16), "b1": b1p,
        "w2": w2p.astype(bf16), "b2": b2p,
        "w3": w3p.astype(bf16), "b3": b3p,
        "f1": f1.astype(bf16),
        "fb1": _pad_axis(p["fc1_b"], 0, hpad).reshape(1, hpad),
        "f2": f2.astype(bf16),
        "fb2": _pad_axis(p["fc2_b"], 0, apad).reshape(1, apad),
    }


def cnn_agent_dueling_forward(kparams, x_nchw, n_actions):
    batch = x_nchw.shape[0]
    x = jnp.transpose(x_nchw, (0, 2, 3, 1))       # single NCHW->NHWC hop
    patches, h1, w1 = _conv1_patches_phase_packed(x, 8, 8, 4)
    patches = patches.astype(jnp.bfloat16)        # bf16 MXU operand, half HBM
    h2, w2 = (h1 - 4) // 2 + 1, (w1 - 4) // 2 + 1
    h3, w3 = h2 - 2, w2 - 2
    gh, gw = h1 // 2, w1 // 2
    bblk = _pick_bblk(batch)
    nb = batch // bblk
    patches = patches.reshape(nb, bblk * gh * gw, patches.shape[-1])

    head = _fused_forward(patches, kparams, batch=batch, bblk=bblk,
                          gh=gh, gw=gw, h2=h2, w2=w2, h3=h3, w3=w3)
    head = head.reshape(batch, -1)[:, :n_actions]
    # value + advantage - advantage.mean(): value/advantage alias the same
    # nn.Sequential in the reference module, and .mean() is a batch-global
    # scalar (couples all batch blocks of the parallel grid), so it is
    # finalized here with three tiny XLA ops.
    return 2.0 * head - jnp.mean(head)


def init_params(key, in_channels, conv_out_size, n_actions, hidden_dim):
    ks = jax.random.split(key, 10)

    def u(k, shape, fan_in):
        bound = 1.0 / jnp.sqrt(jnp.float32(fan_in))
        return jax.random.uniform(k, shape, jnp.float32, -bound, bound)

    return {
        # PyTorch Conv2d layout (Cout, Cin, kh, kw).
        "c1_w": u(ks[0], (32, in_channels, 8, 8), in_channels * 8 * 8),
        "c1_b": u(ks[1], (32,), in_channels * 8 * 8),
        "c2_w": u(ks[2], (64, 32, 4, 4), 32 * 4 * 4),
        "c2_b": u(ks[3], (64,), 32 * 4 * 4),
        "c3_w": u(ks[4], (64, 64, 3, 3), 64 * 3 * 3),
        "c3_b": u(ks[5], (64,), 64 * 3 * 3),
        # Linear weights stored (in, out); fc1's input features are in
        # NHWC-flatten order (h, w, c) - identical to PyTorch's CHW flatten
        # here because the conv output is 1x1 (permute when importing torch
        # weights with spatial > 1).
        "fc1_w": u(ks[6], (conv_out_size, hidden_dim), conv_out_size),
        "fc1_b": u(ks[7], (hidden_dim,), conv_out_size),
        "fc2_w": u(ks[8], (hidden_dim, n_actions), hidden_dim),
        "fc2_b": u(ks[9], (n_actions,), hidden_dim),
    }


def reference_forward(params, x_nchw):
    """Pure-JAX f32 reference (lax.conv, HIGHEST precision)."""
    hp = jax.lax.Precision.HIGHEST

    def conv(x, w, b, s):
        y = jax.lax.conv_general_dilated(
            x, w, window_strides=(s, s), padding="VALID",
            dimension_numbers=("NCHW", "OIHW", "NCHW"), precision=hp)
        return jnp.maximum(y + b[None, :, None, None], 0.0)

    b = x_nchw.shape[0]
    y = conv(x_nchw, params["c1_w"], params["c1_b"], 4)
    y = conv(y, params["c2_w"], params["c2_b"], 2)
    y = conv(y, params["c3_w"], params["c3_b"], 1)
    co = jnp.transpose(y, (0, 2, 3, 1)).reshape(b, -1)   # NHWC flatten (see fc1_w)
    h = jnp.maximum(jnp.dot(co, params["fc1_w"], precision=hp)
                    + params["fc1_b"], 0.0)
    head = jnp.dot(h, params["fc2_w"], precision=hp) + params["fc2_b"]
    return head + head - jnp.mean(head)


if __name__ == "__main__":
    key = jax.random.PRNGKey(0)
    k_x, k_p = jax.random.split(key)

    # Smallest spatial size surviving the conv stack: 36 -> 8 -> 3 -> 1.
    batch, in_ch, spatial = 2, 4, 36
    n_actions, hidden_dim = 6, 32
    conv_out_size = 64 * 1 * 1

    x = jax.random.normal(k_x, (batch, in_ch, spatial, spatial), jnp.float32)
    params = init_params(k_p, in_ch, conv_out_size, n_actions, hidden_dim)
    kparams = prepare_params(params)     # one-time layout permute + bf16 cast

    fwd = jax.jit(cnn_agent_dueling_forward, static_argnames="n_actions")
    out = jax.block_until_ready(fwd(kparams, x, n_actions=n_actions))

    ref = jax.block_until_ready(jax.jit(reference_forward)(params, x))
    assert out.shape == (batch, n_actions)
    err = float(jnp.max(jnp.abs(out - ref)))
    # bf16 MXU operands (f32 accumulation) vs f32 reference -> loose tolerance.
    assert jnp.allclose(out, ref, atol=5e-2, rtol=5e-2), err
    print("KERNEL_OK")
</pallas_src>

<mosaic_0001>
module attributes {stable_mosaic.version = 11 : i64} {
  func.func @_fused_dueling_cnn_kernel(%arg0: i32, %arg1: memref<1x16x1024xbf16, #tpu.memory_space<vmem>>, %arg2: memref<1024x128xbf16, #tpu.memory_space<vmem>>, %arg3: memref<1x128xf32, #tpu.memory_space<vmem>>, %arg4: memref<512x128xbf16, #tpu.memory_space<vmem>>, %arg5: memref<1x128xf32, #tpu.memory_space<vmem>>, %arg6: memref<1152x128xbf16, #tpu.memory_space<vmem>>, %arg7: memref<1x128xf32, #tpu.memory_space<vmem>>, %arg8: memref<128x128xbf16, #tpu.memory_space<vmem>>, %arg9: memref<1x128xf32, #tpu.memory_space<vmem>>, %arg10: memref<128x128xbf16, #tpu.memory_space<vmem>>, %arg11: memref<1x128xf32, #tpu.memory_space<vmem>>, %arg12: memref<1x1x128xf32, #tpu.memory_space<vmem>>) attributes {dimension_semantics = [#tpu.dimension_semantics<parallel>], iteration_bounds = array<i64: 2>, scalar_prefetch = 0 : i64, scratch_operands = 0 : i64, tpu.core_type = #tpu.core_type<tc>, window_params = [{transform_indices = @transform_0, window_bounds = array<i64: 1, 16, 1024>}, {pipeline_mode = #tpu.pipeline_mode<synchronous>, transform_indices = @transform_1, window_bounds = array<i64: 1024, 128>}, {pipeline_mode = #tpu.pipeline_mode<synchronous>, transform_indices = @transform_2, window_bounds = array<i64: 1, 128>}, {pipeline_mode = #tpu.pipeline_mode<synchronous>, transform_indices = @transform_3, window_bounds = array<i64: 512, 128>}, {pipeline_mode = #tpu.pipeline_mode<synchronous>, transform_indices = @transform_4, window_bounds = array<i64: 1, 128>}, {pipeline_mode = #tpu.pipeline_mode<synchronous>, transform_indices = @transform_5, window_bounds = array<i64: 1152, 128>}, {pipeline_mode = #tpu.pipeline_mode<synchronous>, transform_indices = @transform_6, window_bounds = array<i64: 1, 128>}, {pipeline_mode = #tpu.pipeline_mode<synchronous>, transform_indices = @transform_7, window_bounds = array<i64: 128, 128>}, {pipeline_mode = #tpu.pipeline_mode<synchronous>, transform_indices = @transform_8, window_bounds = array<i64: 1, 128>}, {pipeline_mode = #tpu.pipeline_mode<synchronous>, transform_indices = @transform_9, window_bounds = array<i64: 128, 128>}, {pipeline_mode = #tpu.pipeline_mode<synchronous>, transform_indices = @transform_10, window_bounds = array<i64: 1, 128>}, {transform_indices = @transform_11, window_bounds = array<i64: 1, 1, 128>}]} {
    %c0 = arith.constant 0 : index
    %c0_0 = arith.constant 0 : index
    %c0_1 = arith.constant 0 : index
    %0 = vector.load %arg1[%c0, %c0_0, %c0_1] : memref<1x16x1024xbf16, #tpu.memory_space<vmem>>, vector<1x16x1024xbf16>
    %1 = vector.shape_cast %0 : vector<1x16x1024xbf16> to vector<16x1024xbf16>
    %c0_2 = arith.constant 0 : index
    %c0_3 = arith.constant 0 : index
    %2 = vector.load %arg2[%c0_2, %c0_3] : memref<1024x128xbf16, #tpu.memory_space<vmem>>, vector<1024x128xbf16>
    %cst = arith.constant dense<0.000000e+00> : vector<16x128xf32>
    %3 = tpu.matmul %1, %2, %cst {dimension_numbers = #tpu.dot_dimension_numbers<[1], [0], [0], [1], [0, 0, 1, 1], [], []>} : vector<16x1024xbf16>, vector<1024x128xbf16>, vector<16x128xf32> -> vector<16x128xf32>
    %c0_4 = arith.constant 0 : index
    %c0_5 = arith.constant 0 : index
    %4 = vector.load %arg3[%c0_4, %c0_5] : memref<1x128xf32, #tpu.memory_space<vmem>>, vector<1x128xf32>
    %5 = vector.broadcast %4 : vector<1x128xf32> to vector<16x128xf32>
    %6 = arith.addf %3, %5 : vector<16x128xf32>
    %cst_6 = arith.constant 0.000000e+00 : f32
    %7 = vector.broadcast %cst_6 : f32 to vector<16x128xf32>
    %8 = arith.maximumf %6, %7 : vector<16x128xf32>
    %9 = arith.truncf %8 : vector<16x128xf32> to vector<16x128xbf16>
    %10 = vector.shape_cast %9 : vector<16x128xbf16> to vector<1x4x4x128xbf16>
    %11 = vector.extract_strided_slice %10 {offsets = [0, 0, 0, 0], sizes = [1, 3, 3, 128], strides = [1, 1, 1, 1]} : vector<1x4x4x128xbf16> to vector<1x3x3x128xbf16>
    %12 = vector.extract_strided_slice %10 {offsets = [0, 0, 1, 0], sizes = [1, 3, 3, 128], strides = [1, 1, 1, 1]} : vector<1x4x4x128xbf16> to vector<1x3x3x128xbf16>
    %13 = vector.extract_strided_slice %10 {offsets = [0, 1, 0, 0], sizes = [1, 3, 3, 128], strides = [1, 1, 1, 1]} : vector<1x4x4x128xbf16> to vector<1x3x3x128xbf16>
    %14 = vector.extract_strided_slice %10 {offsets = [0, 1, 1, 0], sizes = [1, 3, 3, 128], strides = [1, 1, 1, 1]} : vector<1x4x4x128xbf16> to vector<1x3x3x128xbf16>
    %15 = tpu.concatenate %11, %12, %13, %14 in 3 : vector<1x3x3x128xbf16>, vector<1x3x3x128xbf16>, vector<1x3x3x128xbf16>, vector<1x3x3x128xbf16> -> vector<1x3x3x512xbf16>
    %16 = vector.shape_cast %15 : vector<1x3x3x512xbf16> to vector<9x512xbf16>
    %c0_7 = arith.constant 0 : index
    %c0_8 = arith.constant 0 : index
    %17 = vector.load %arg4[%c0_7, %c0_8] : memref<512x128xbf16, #tpu.memory_space<vmem>>, vector<512x128xbf16>
    %cst_9 = arith.constant dense<0.000000e+00> : vector<9x128xf32>
    %18 = tpu.matmul %16, %17, %cst_9 {dimension_numbers = #tpu.dot_dimension_numbers<[1], [0], [0], [1], [0, 0, 1, 1], [], []>} : vector<9x512xbf16>, vector<512x128xbf16>, vector<9x128xf32> -> vector<9x128xf32>
    %c0_10 = arith.constant 0 : index
    %c0_11 = arith.constant 0 : index
    %19 = vector.load %arg5[%c0_10, %c0_11] : memref<1x128xf32, #tpu.memory_space<vmem>>, vector<1x128xf32>
    %20 = vector.broadcast %19 : vector<1x128xf32> to vector<9x128xf32>
    %21 = arith.addf %18, %20 : vector<9x128xf32>
    %cst_12 = arith.constant 0.000000e+00 : f32
    %22 = vector.broadcast %cst_12 : f32 to vector<9x128xf32>
    %23 = arith.maximumf %21, %22 : vector<9x128xf32>
    %24 = arith.truncf %23 : vector<9x128xf32> to vector<9x128xbf16>
    %25 = vector.shape_cast %24 : vector<9x128xbf16> to vector<1x3x3x128xbf16>
    %26 = vector.extract_strided_slice %25 {offsets = [0, 0, 0, 0], sizes = [1, 1, 1, 128], strides = [1, 1, 1, 1]} : vector<1x3x3x128xbf16> to vector<1x1x1x128xbf16>
    %27 = vector.extract_strided_slice %25 {offsets = [0, 0, 1, 0], sizes = [1, 1, 1, 128], strides = [1, 1, 1, 1]} : vector<1x3x3x128xbf16> to vector<1x1x1x128xbf16>
    %28 = vector.extract_strided_slice %25 {offsets = [0, 0, 2, 0], sizes = [1, 1, 1, 128], strides = [1, 1, 1, 1]} : vector<1x3x3x128xbf16> to vector<1x1x1x128xbf16>
    %29 = vector.extract_strided_slice %25 {offsets = [0, 1, 0, 0], sizes = [1, 1, 1, 128], strides = [1, 1, 1, 1]} : vector<1x3x3x128xbf16> to vector<1x1x1x128xbf16>
    %30 = vector.extract_strided_slice %25 {offsets = [0, 1, 1, 0], sizes = [1, 1, 1, 128], strides = [1, 1, 1, 1]} : vector<1x3x3x128xbf16> to vector<1x1x1x128xbf16>
    %31 = vector.extract_strided_slice %25 {offsets = [0, 1, 2, 0], sizes = [1, 1, 1, 128], strides = [1, 1, 1, 1]} : vector<1x3x3x128xbf16> to vector<1x1x1x128xbf16>
    %32 = vector.extract_strided_slice %25 {offsets = [0, 2, 0, 0], sizes = [1, 1, 1, 128], strides = [1, 1, 1, 1]} : vector<1x3x3x128xbf16> to vector<1x1x1x128xbf16>
    %33 = vector.extract_strided_slice %25 {offsets = [0, 2, 1, 0], sizes = [1, 1, 1, 128], strides = [1, 1, 1, 1]} : vector<1x3x3x128xbf16> to vector<1x1x1x128xbf16>
    %34 = vector.extract_strided_slice %25 {offsets = [0, 2, 2, 0], sizes = [1, 1, 1, 128], strides = [1, 1, 1, 1]} : vector<1x3x3x128xbf16> to vector<1x1x1x128xbf16>
    %35 = tpu.concatenate %26, %27, %28, %29, %30, %31, %32, %33, %34 in 3 : vector<1x1x1x128xbf16>, vector<1x1x1x128xbf16>, vector<1x1x1x128xbf16>, vector<1x1x1x128xbf16>, vector<1x1x1x128xbf16>, vector<1x1x1x128xbf16>, vector<1x1x1x128xbf16>, vector<1x1x1x128xbf16>, vector<1x1x1x128xbf16> -> vector<1x1x1x1152xbf16>
    %36 = vector.shape_cast %35 : vector<1x1x1x1152xbf16> to vector<1x1152xbf16>
    %c0_13 = arith.constant 0 : index
    %c0_14 = arith.constant 0 : index
    %37 = vector.load %arg6[%c0_13, %c0_14] : memref<1152x128xbf16, #tpu.memory_space<vmem>>, vector<1152x128xbf16>
    %cst_15 = arith.constant dense<0.000000e+00> : vector<1x128xf32>
    %38 = tpu.matmul %36, %37, %cst_15 {dimension_numbers = #tpu.dot_dimension_numbers<[1], [0], [0], [1], [0, 0, 1, 1], [], []>} : vector<1x1152xbf16>, vector<1152x128xbf16>, vector<1x128xf32> -> vector<1x128xf32>
    %c0_16 = arith.constant 0 : index
    %c0_17 = arith.constant 0 : index
    %39 = vector.load %arg7[%c0_16, %c0_17] : memref<1x128xf32, #tpu.memory_space<vmem>>, vector<1x128xf32>
    %40 = arith.addf %38, %39 : vector<1x128xf32>
    %cst_18 = arith.constant 0.000000e+00 : f32
    %41 = vector.broadcast %cst_18 : f32 to vector<1x128xf32>
    %42 = arith.maximumf %40, %41 : vector<1x128xf32>
    %43 = arith.truncf %42 : vector<1x128xf32> to vector<1x128xbf16>
    %c0_19 = arith.constant 0 : index
    %c0_20 = arith.constant 0 : index
    %44 = vector.load %arg8[%c0_19, %c0_20] : memref<128x128xbf16, #tpu.memory_space<vmem>>, vector<128x128xbf16>
    %cst_21 = arith.constant dense<0.000000e+00> : vector<1x128xf32>
    %45 = tpu.matmul %43, %44, %cst_21 {dimension_numbers = #tpu.dot_dimension_numbers<[1], [0], [0], [1], [0, 0, 1, 1], [], []>} : vector<1x128xbf16>, vector<128x128xbf16>, vector<1x128xf32> -> vector<1x128xf32>
    %c0_22 = arith.constant 0 : index
    %c0_23 = arith.constant 0 : index
    %46 = vector.load %arg9[%c0_22, %c0_23] : memref<1x128xf32, #tpu.memory_space<vmem>>, vector<1x128xf32>
    %47 = arith.addf %45, %46 : vector<1x128xf32>
    %cst_24 = arith.constant 0.000000e+00 : f32
    %48 = vector.broadcast %cst_24 : f32 to vector<1x128xf32>
    %49 = arith.maximumf %47, %48 : vector<1x128xf32>
    %50 = arith.truncf %49 : vector<1x128xf32> to vector<1x128xbf16>
    %c0_25 = arith.constant 0 : index
    %c0_26 = arith.constant 0 : index
    %51 = vector.load %arg10[%c0_25, %c0_26] : memref<128x128xbf16, #tpu.memory_space<vmem>>, vector<128x128xbf16>
    %cst_27 = arith.constant dense<0.000000e+00> : vector<1x128xf32>
    %52 = tpu.matmul %50, %51, %cst_27 {dimension_numbers = #tpu.dot_dimension_numbers<[1], [0], [0], [1], [0, 0, 1, 1], [], []>} : vector<1x128xbf16>, vector<128x128xbf16>, vector<1x128xf32> -> vector<1x128xf32>
    %c0_28 = arith.constant 0 : index
    %c0_29 = arith.constant 0 : index
    %53 = vector.load %arg11[%c0_28, %c0_29] : memref<1x128xf32, #tpu.memory_space<vmem>>, vector<1x128xf32>
    %54 = arith.addf %52, %53 : vector<1x128xf32>
    %c0_30 = arith.constant 0 : index
    %c0_31 = arith.constant 0 : index
    %c0_32 = arith.constant 0 : index
    %55 = vector.load %arg12[%c0_30, %c0_31, %c0_32] : memref<1x1x128xf32, #tpu.memory_space<vmem>>, vector<1x1x128xf32>
    %56 = vector.shape_cast %55 : vector<1x1x128xf32> to vector<1x128xf32>
    %57 = vector.shape_cast %54 : vector<1x128xf32> to vector<1x1x128xf32>
    tpu.vector_store %arg12[%c0_30, %c0_31, %c0_32], %57 {strides = array<i32>} : memref<1x1x128xf32, #tpu.memory_space<vmem>>, vector<1x1x128xf32>,
    return
  }
  func.func @transform_0(%arg0: i32) -> (i32, i32, i32) {
    %c0_i32 = arith.constant 0 : i32
    %c0_i32_0 = arith.constant 0 : i32
    %c0_i32_1 = arith.constant 0 : i32
    return %arg0, %c0_i32, %c0_i32_0 : i32, i32, i32
  }
  func.func @transform_1(%arg0: i32) -> (i32, i32) {
    %c0_i32 = arith.constant 0 : i32
    %c0_i32_0 = arith.constant 0 : i32
    %c0_i32_1 = arith.constant 0 : i32
    return %c0_i32, %c0_i32_0 : i32, i32
  }
  func.func @transform_2(%arg0: i32) -> (i32, i32) {
    %c0_i32 = arith.constant 0 : i32
    %c0_i32_0 = arith.constant 0 : i32
    %c0_i32_1 = arith.constant 0 : i32
    return %c0_i32, %c0_i32_0 : i32, i32
  }
  func.func @transform_3(%arg0: i32) -> (i32, i32) {
    %c0_i32 = arith.constant 0 : i32
    %c0_i32_0 = arith.constant 0 : i32
    %c0_i32_1 = arith.constant 0 : i32
    return %c0_i32, %c0_i32_0 : i32, i32
  }
  func.func @transform_4(%arg0: i32) -> (i32, i32) {
    %c0_i32 = arith.constant 0 : i32
    %c0_i32_0 = arith.constant 0 : i32
    %c0_i32_1 = arith.constant 0 : i32
    return %c0_i32, %c0_i32_0 : i32, i32
  }
  func.func @transform_5(%arg0: i32) -> (i32, i32) {
    %c0_i32 = arith.constant 0 : i32
    %c0_i32_0 = arith.constant 0 : i32
    %c0_i32_1 = arith.constant 0 : i32
    return %c0_i32, %c0_i32_0 : i32, i32
  }
  func.func @transform_6(%arg0: i32) -> (i32, i32) {
    %c0_i32 = arith.constant 0 : i32
    %c0_i32_0 = arith.constant 0 : i32
    %c0_i32_1 = arith.constant 0 : i32
    return %c0_i32, %c0_i32_0 : i32, i32
  }
  func.func @transform_7(%arg0: i32) -> (i32, i32) {
    %c0_i32 = arith.constant 0 : i32
    %c0_i32_0 = arith.constant 0 : i32
    %c0_i32_1 = arith.constant 0 : i32
    return %c0_i32, %c0_i32_0 : i32, i32
  }
  func.func @transform_8(%arg0: i32) -> (i32, i32) {
    %c0_i32 = arith.constant 0 : i32
    %c0_i32_0 = arith.constant 0 : i32
    %c0_i32_1 = arith.constant 0 : i32
    return %c0_i32, %c0_i32_0 : i32, i32
  }
  func.func @transform_9(%arg0: i32) -> (i32, i32) {
    %c0_i32 = arith.constant 0 : i32
    %c0_i32_0 = arith.constant 0 : i32
    %c0_i32_1 = arith.constant 0 : i32
    return %c0_i32, %c0_i32_0 : i32, i32
  }
  func.func @transform_10(%arg0: i32) -> (i32, i32) {
    %c0_i32 = arith.constant 0 : i32
    %c0_i32_0 = arith.constant 0 : i32
    %c0_i32_1 = arith.constant 0 : i32
    return %c0_i32, %c0_i32_0 : i32, i32
  }
  func.func @transform_11(%arg0: i32) -> (i32, i32, i32) {
    %c0_i32 = arith.constant 0 : i32
    %c0_i32_0 = arith.constant 0 : i32
    %c0_i32_1 = arith.constant 0 : i32
    return %arg0, %c0_i32, %c0_i32_0 : i32, i32, i32
  }
}

</mosaic_0001>

<bundles_post_ra>
// kernel: cnn_agent_dueling_forward.1
= control target key start
LH: loop header
LB: loop body
LE: loop exit
PB: predicated region body
PF: predicated region fallthrough
CT: control target
= control target key end

     0   :  { %s3536_s17 = smov 0   ;;  %s4176_s0 = inlined_call_operand.vmem [shape: bf16[2,16,1024], index: 0, kind: input, shape index: {}]   ;;  %s4177_s1 = inlined_call_operand.vmem [shape: bf16[1024,128], index: 1, kind: input, shape index: {}]   ;;  %s4178_s2 = inlined_call_operand.vmem [shape: f32[1,128], index: 2, kind: input, shape index: {}]   ;;  %s4179_s3 = inlined_call_operand.vmem [shape: bf16[512,128], index: 3, kind: input, shape index: {}]   ;;  %s4180_s4 = inlined_call_operand.vmem [shape: f32[1,128], index: 4, kind: input, shape index: {}]   ;;  %s4181_s5 = inlined_call_operand.vmem [shape: bf16[1152,128], index: 5, kind: input, shape index: {}]   ;;  %s4182_s6 = inlined_call_operand.vmem [shape: f32[1,128], index: 6, kind: input, shape index: {}]   ;;  %s4183_s7 = inlined_call_operand.vmem [shape: bf16[128,128], index: 7, kind: input, shape index: {}]   ;;  %s4184_s8 = inlined_call_operand.vmem [shape: f32[1,128], index: 8, kind: input, shape index: {}]   ;;  %s4185_s9 = inlined_call_operand.vmem [shape: bf16[128,128], index: 9, kind: input, shape index: {}]   ;;  %s4186_s10 = inlined_call_operand.vmem [shape: f32[1,128], index: 10, kind: input, shape index: {}]   ;;  %s4187_s11 = inlined_call_operand.vmem [shape: f32[2,1,128], index: 11, kind: output, shape index: {}]  }
   0x1 LB: > { %s2754_s18 = sadd.s32 4294967295, %s3470_s17   ;;  %p2758_p0 = scmp.ge.s32.totalorder %s3470_s17, 1  ;;  %s3470_s17 = sphi %s3536_s17, %s21_s17  }
   0x2   : > { %p337_p1 = scmp.lt.s32.totalorder %s3470_s17, 3 }
   0x4   : > { %p338_p2 = pnand %p2758_p0, %p337_p1 }
   0x5   : > { %v3280_v0 = vld [vmem:[%s4177_s1 + $0x40] sm:$0xff] (!%p338_p2)   ;;  %v3284_v4 = vld [vmem:[%s4177_s1 + $0x48] sm:$0xff] (!%p338_p2)   ;;  %v3288_v8 = vld [vmem:[%s4177_s1 + $0x50] sm:$0xff] (!%p338_p2)   ;;  %p375_p3 = scmp.lt.s32.totalorder (!%p338_p2), %s2754_s18, 1  ;;  %vm3475_vm0 = vmmov (!%p338_p2), 0  }
   0x6   : > { %341 = sbr.rel (%p338_p2) target bundleno = 1274 (0x4fa), region = 64  ;;  %v3281_v1 = vld [vmem:[%s4177_s1 + $0xc0] sm:$0xff] (!%p338_p2)   ;;  %2961 = vmatprep.subr.bf16.mxu0 (!%p338_p2), %v3280_v0  ;;  %v3285_v5 = vld [vmem:[%s4177_s1 + $0xc8] sm:$0xff] (!%p338_p2)   ;;  %v3289_v9 = vld [vmem:[%s4177_s1 + $0xd0] sm:$0xff] (!%p338_p2)  }
   0x7   : > { %v3282_v2 = vld [vmem:[%s4177_s1] sm:$0xff] (!%p338_p2)   ;;  %2983 = vmatprep.subr.bf16.mxu1 (!%p338_p2), %v3281_v1  ;;  %v3286_v6 = vld [vmem:[%s4177_s1 + $0x8] sm:$0xff] (!%p338_p2)   ;;  %v3290_v10 = vld [vmem:[%s4177_s1 + $0x10] sm:$0xff] (!%p338_p2)  }
   0x8   : > { %v3283_v3 = vld [vmem:[%s4177_s1 + $0x80] sm:$0xff] (!%p338_p2)   ;;  %2962 = vmatpush3.bf16.msra.mxu0 (!%p338_p2), %v3282_v2  ;;  %v3287_v7 = vld [vmem:[%s4177_s1 + $0x88] sm:$0xff] (!%p338_p2)   ;;  %v3291_v11 = vld [vmem:[%s4177_s1 + $0x90] sm:$0xff] (!%p338_p2)  }
   0x9   : > { %2984 = vmatpush3.bf16.msra.mxu1 (!%p338_p2), %v3283_v3  ;;  %2963 = vmatprep.subr.bf16.mxu0 (!%p338_p2), %v3284_v4  ;;  %v3292_v12 = vld [vmem:[%s4177_s1 + $0x58] sm:$0xff] (!%p338_p2)   ;;  %v3296_v16 = vld [vmem:[%s4177_s1 + $0x60] sm:$0xff] (!%p338_p2)   ;;  %v3300_v20 = vld [vmem:[%s4177_s1 + $0x68] sm:$0xff] (!%p338_p2)  }
   0xa   : > { %2985 = vmatprep.subr.bf16.mxu1 (!%p338_p2), %v3285_v5  ;;  %v3293_v13 = vld [vmem:[%s4177_s1 + $0xd8] sm:$0xff] (!%p338_p2)   ;;  %v3297_v17 = vld [vmem:[%s4177_s1 + $0xe0] sm:$0xff] (!%p338_p2)   ;;  %v3301_v21 = vld [vmem:[%s4177_s1 + $0xe8] sm:$0xff] (!%p338_p2)  }
   0xb   : > { %v3294_v14 = vld [vmem:[%s4177_s1 + $0x18] sm:$0xff] (!%p338_p2)   ;;  %v3298_v18 = vld [vmem:[%s4177_s1 + $0x20] sm:$0xff] (!%p338_p2)   ;;  %v3302_v22 = vld [vmem:[%s4177_s1 + $0x28] sm:$0xff] (!%p338_p2)  }
   0xc   : > { %2964 = vmatpush3.bf16.msra.mxu0 (!%p338_p2), %v3286_v6  ;;  %v3295_v15 = vld [vmem:[%s4177_s1 + $0x98] sm:$0xff] (!%p338_p2)   ;;  %v3299_v19 = vld [vmem:[%s4177_s1 + $0xa0] sm:$0xff] (!%p338_p2)   ;;  %v3303_v23 = vld [vmem:[%s4177_s1 + $0xa8] sm:$0xff] (!%p338_p2)  }
   0xd   : > { %2986 = vmatpush3.bf16.msra.mxu1 %v3287_v7  ;;  %2965 = vmatprep.subr.bf16.mxu0 %v3288_v8  ;;  %s4189_s18 = smov (!%p375_p3, %s2754_s18), 1  ;;  %v3304_v24 = vld [vmem:[%s4177_s1 + $0x70] sm:$0xff]   ;;  %v3308_v28 = vld [vmem:[%s4177_s1 + $0x78] sm:$0xff]   ;;  %v3312_v40 = vld [vmem:[%s4177_s1 + $0x140] sm:$0xff]  }
   0xe   : > { %2987 = vmatprep.subr.bf16.mxu1 %v3289_v9  ;;  %v3305_v25 = vld [vmem:[%s4177_s1 + $0xf0] sm:$0xff]   ;;  %s2960_s22 = sshll.u32 %s4189_s18, 6  ;;  %v3309_v29 = vld [vmem:[%s4177_s1 + $0xf8] sm:$0xff]   ;;  %v3313_v41 = vld [vmem:[%s4177_s1 + $0x1c0] sm:$0xff]   ;;  %s382_s14 = scalar_lea.vmem %s4187_s11, %s4189_s18 }
   0xf   : > { %v3306_v26 = vld [vmem:[%s4177_s1 + $0x30] sm:$0xff]   ;;  %s3644_s12 = scalar_lea.vmem %s4176_s0, %s2960_s22  ;;  %v3310_v30 = vld [vmem:[%s4177_s1 + $0x38] sm:$0xff]   ;;  %v3314_v42 = vld [vmem:[%s4177_s1 + $0x100] sm:$0xff]  }
  0x10   : > { %2966 = vmatpush3.bf16.msra.mxu0 %v3290_v10  ;;  %v3307_v27 = vld [vmem:[%s4177_s1 + $0xb0] sm:$0xff]   ;;  %v3311_v31 = vld [vmem:[%s4177_s1 + $0xb8] sm:$0xff]   ;;  %v384_v32 = vld [vmem:[%s3644_s12] sm:$0xff] }
  0x11   : > { %2988 = vmatpush3.bf16.msra.mxu1 %v3291_v11  ;;  %2967 = vmatprep.subr.bf16.mxu0 %v3292_v12  ;;  %v388_v33 = vld [vmem:[%s3644_s12 + $0x20] sm:$0xff]  ;;  %v385_v34 = vld [vmem:[%s3644_s12 + $0x8] sm:$0xff]  ;;  %v3320_v48 = vld [vmem:[%s4177_s1 + $0x150] sm:$0xff]  }
  0x12   : > { %2989 = vmatprep.subr.bf16.mxu1 %v3293_v13  ;;  %v2762_v35 = vcombine.low %v384_v32, %v388_v33  ;;  %v2763_v36 = vcombine.high %v384_v32, %v388_v33  ;;  %v389_v37 = vld [vmem:[%s3644_s12 + $0x28] sm:$0xff]  ;;  %v3315_v43 = vld [vmem:[%s4177_s1 + $0x180] sm:$0xff]   ;;  %v3321_v49 = vld [vmem:[%s4177_s1 + $0x1d0] sm:$0xff]  }
  0x13   : > { %v2764_v38 = vcombine.low %v385_v34, %v389_v37  ;;  %v2765_v39 = vcombine.high %v385_v34, %v389_v37  ;;  %v3316_v44 = vld [vmem:[%s4177_s1 + $0x148] sm:$0xff]   ;;  %v3322_v50 = vld [vmem:[%s4177_s1 + $0x110] sm:$0xff]   ;;  %v3324_v52 = vld [vmem:[%s4177_s1 + $0x158] sm:$0xff]  }
  0x14   : > { %2968 = vmatpush3.bf16.msra.mxu0 %v3294_v14  ;;  %983 = vmatprep.mubr.bf16.mxu0 %v2763_v36  ;;  %v3317_v45 = vld [vmem:[%s4177_s1 + $0x1c8] sm:$0xff]   ;;  %v3323_v51 = vld [vmem:[%s4177_s1 + $0x190] sm:$0xff]   ;;  %v3325_v53 = vld [vmem:[%s4177_s1 + $0x1d8] sm:$0xff]  }
  0x15   : > { %2990 = vmatpush3.bf16.msra.mxu1 %v3295_v15  ;;  %2969 = vmatprep.subr.bf16.mxu0 %v3296_v16  ;;  %v3318_v46 = vld [vmem:[%s4177_s1 + $0x108] sm:$0xff]   ;;  %v3326_v54 = vld [vmem:[%s4177_s1 + $0x118] sm:$0xff]   ;;  %v3328_v56 = vld [vmem:[%s4177_s1 + $0x160] sm:$0xff]  }
  0x16   : > { %2991 = vmatprep.subr.bf16.mxu1 %v3297_v17  ;;  %1024 = vmatprep.mubr.bf16.mxu1 %v2765_v39  ;;  %v3319_v47 = vld [vmem:[%s4177_s1 + $0x188] sm:$0xff]   ;;  %v3327_v55 = vld [vmem:[%s4177_s1 + $0x198] sm:$0xff]   ;;  %v3329_v57 = vld [vmem:[%s4177_s1 + $0x1e0] sm:$0xff]  }
  0x17   : > { %v3330_v58 = vld [vmem:[%s4177_s1 + $0x120] sm:$0xff]   ;;  %v3332_v60 = vld [vmem:[%s4177_s1 + $0x168] sm:$0xff]   ;;  %v3336_v0 = vld [vmem:[%s4177_s1 + $0x170] sm:$0xff]  }
  0x18   : > { %2970 = vmatpush3.bf16.msra.mxu0 %v3298_v18  ;;  %v3331_v59 = vld [vmem:[%s4177_s1 + $0x1a0] sm:$0xff]   ;;  %v3333_v61 = vld [vmem:[%s4177_s1 + $0x1e8] sm:$0xff]   ;;  %v3337_v1 = vld [vmem:[%s4177_s1 + $0x1f0] sm:$0xff]  }
  0x19   : > { %2992 = vmatpush3.bf16.msra.mxu1 %v3299_v19  ;;  %2971 = vmatprep.subr.bf16.mxu0 %v3300_v20  ;;  %v3334_v62 = vld [vmem:[%s4177_s1 + $0x128] sm:$0xff]   ;;  %v3338_v2 = vld [vmem:[%s4177_s1 + $0x130] sm:$0xff]   ;;  %v3340_v4 = vld [vmem:[%s4177_s1 + $0x178] sm:$0xff]  }
  0x1a   : > { %2993 = vmatprep.subr.bf16.mxu1 %v3301_v21  ;;  %v3335_v63 = vld [vmem:[%s4177_s1 + $0x1a8] sm:$0xff]   ;;  %v3339_v3 = vld [vmem:[%s4177_s1 + $0x1b0] sm:$0xff]   ;;  %v3341_v5 = vld [vmem:[%s4177_s1 + $0x1f8] sm:$0xff]  }
  0x1b   : > { %v3342_v6 = vld [vmem:[%s4177_s1 + $0x138] sm:$0xff]   ;;  %v386_v8 = vld [vmem:[%s3644_s12 + $0x10] sm:$0xff]  ;;  %v3344_v16 = vld [vmem:[%s4179_s3 + $0x40] sm:$0xff]  }
  0x1c   : > { %2972 = vmatpush3.bf16.msra.mxu0 %v3302_v22  ;;  %v3343_v7 = vld [vmem:[%s4177_s1 + $0x1b8] sm:$0xff]   ;;  %v390_v9 = vld [vmem:[%s3644_s12 + $0x30] sm:$0xff]  ;;  %v3345_v17 = vld [vmem:[%s4179_s3 + $0xc0] sm:$0xff]  }
  0x1d   : > { %2994 = vmatpush3.bf16.msra.mxu1 %v3303_v23  ;;  %2973 = vmatprep.subr.bf16.mxu0 %v3304_v24  ;;  %v2766_v10 = vcombine.low %v386_v8, %v390_v9  ;;  %v2767_v11 = vcombine.high %v386_v8, %v390_v9  ;;  %v387_v12 = vld [vmem:[%s3644_s12 + $0x18] sm:$0xff]  ;;  %v3346_v18 = vld [vmem:[%s4179_s3] sm:$0xff]   ;;  %v3348_v20 = vld [vmem:[%s4179_s3 + $0x48] sm:$0xff]   ;;  %v3472_v9 = vmov 1983009808  }
  0x1e   : > { %2995 = vmatprep.subr.bf16.mxu1 %v3305_v25  ;;  %v391_v13 = vld [vmem:[%s3644_s12 + $0x38] sm:$0xff]  ;;  %v3347_v19 = vld [vmem:[%s4179_s3 + $0x80] sm:$0xff]   ;;  %v3349_v21 = vld [vmem:[%s4179_s3 + $0xc8] sm:$0xff]  }
  0x1f   : > { %v2768_v14 = vcombine.low %v387_v12, %v391_v13  ;;  %v2769_v15 = vcombine.high %v387_v12, %v391_v13  ;;  %v3350_v22 = vld [vmem:[%s4179_s3 + $0x8] sm:$0xff]   ;;  %v3352_v24 = vld [vmem:[%s4179_s3 + $0x50] sm:$0xff]   ;;  %v3360_v32 = vld [vmem:[%s4179_s3 + $0x60] sm:$0xff]  }
  0x20   : > { %2974 = vmatpush3.bf16.msra.mxu0 %v3306_v26  ;;  %v3351_v23 = vld [vmem:[%s4179_s3 + $0x88] sm:$0xff]   ;;  %v3353_v25 = vld [vmem:[%s4179_s3 + $0xd0] sm:$0xff]   ;;  %v3361_v33 = vld [vmem:[%s4179_s3 + $0xe0] sm:$0xff]  }
  0x21   : > { %2996 = vmatpush3.bf16.msra.mxu1 %v3307_v27  ;;  %2975 = vmatprep.subr.bf16.mxu0 %v3308_v28  ;;  %v3354_v26 = vld [vmem:[%s4179_s3 + $0x10] sm:$0xff]   ;;  %v3356_v28 = vld [vmem:[%s4179_s3 + $0x58] sm:$0xff]   ;;  %v3362_v34 = vld [vmem:[%s4179_s3 + $0x20] sm:$0xff]  }
  0x22   : > { %2997 = vmatprep.subr.bf16.mxu1 %v3309_v29  ;;  %v3355_v27 = vld [vmem:[%s4179_s3 + $0x90] sm:$0xff]   ;;  %v3357_v29 = vld [vmem:[%s4179_s3 + $0xd8] sm:$0xff]   ;;  %v3364_v36 = vld [vmem:[%s4179_s3 + $0x68] sm:$0xff]  }
  0x23   : > { %v3365_v37 = vld [vmem:[%s4179_s3 + $0xe8] sm:$0xff]  }
  0x24   : > { %2976 = vmatpush3.bf16.msra.mxu0 %v3310_v30  ;;  %v3358_v30 = vld [vmem:[%s4179_s3 + $0x18] sm:$0xff]   ;;  %v3367_v39 = vld [vmem:[%s4179_s3 + $0xa8] sm:$0xff]  }
  0x25   : > { %2998 = vmatpush3.bf16.msra.mxu1 %v3311_v31  ;;  %3005 = vmatprep.subr.bf16.mxu0 %v3312_v40  ;;  %v3359_v31 = vld [vmem:[%s4179_s3 + $0x98] sm:$0xff]   ;;  %v3368_v40 = vld [vmem:[%s4179_s3 + $0x70] sm:$0xff]  }
  0x26   : > { %3027 = vmatprep.subr.bf16.mxu1 %v3313_v41  ;;  %v3369_v41 = vld [vmem:[%s4179_s3 + $0xf0] sm:$0xff]  }
  0x27   : > { %984 = vmatmul.mubr.bf16.vlgmr.msra.gmra.mrb[0].mxu0 %v2762_v35  ;;  %v3363_v35 = vld [vmem:[%s4179_s3 + $0xa0] sm:$0xff]  }
  0x28   : > { %1025 = vmatmul.mubr.bf16.vlgmr.msra.gmra.mrb[0].mxu1 %v2764_v38  ;;  %3006 = vmatpush3.bf16.msra.mxu0 %v3314_v42  ;;  %v3366_v38 = vld [vmem:[%s4179_s3 + $0x28] sm:$0xff]   ;;  %v3370_v42 = vld [vmem:[%s4179_s3 + $0x30] sm:$0xff]  }
  0x29   : > { %3028 = vmatpush3.bf16.msra.mxu1 %v3315_v43  ;;  %3007 = vmatprep.subr.bf16.mxu0 %v3316_v44  ;;  %v3371_v43 = vld [vmem:[%s4179_s3 + $0xb0] sm:$0xff]   ;;  %v3372_v44 = vld [vmem:[%s4179_s3 + $0x78] sm:$0xff]  }
  0x2a   : > { %3029 = vmatprep.subr.bf16.mxu1 %v3317_v45  ;;  %1065 = vmatprep.mubr.bf16.mxu0 %v2767_v11  ;;  %v3373_v45 = vld [vmem:[%s4179_s3 + $0xf8] sm:$0xff]   ;;  %v1123_v11 = vlaneseq }
  0x2b   : > { %1106 = vmatprep.mubr.bf16.mxu1 %v2769_v15 }
  0x2c   : > { %3008 = vmatpush3.bf16.msra.mxu0 %v3318_v46  ;;  %v3374_v46 = vld [vmem:[%s4179_s3 + $0x38] sm:$0xff]  }
  0x2d   : > { %3030 = vmatpush3.bf16.msra.mxu1 %v3319_v47  ;;  %3009 = vmatprep.subr.bf16.mxu0 %v3320_v48  ;;  %v3375_v47 = vld [vmem:[%s4179_s3 + $0xb8] sm:$0xff]   ;;  %v3376_v48 = vld [vmem:[%s4181_s5 + $0x40] sm:$0xff]  }
  0x2e   : > { %3031 = vmatprep.subr.bf16.mxu1 %v3321_v49  ;;  %v3378_v49 = vld [vmem:[%s4181_s5 + $0xc0] sm:$0xff]  }
  0x30   : > { %3010 = vmatpush3.bf16.msra.mxu0 %v3322_v50 }
  0x31   : > { %3032 = vmatpush3.bf16.msra.mxu1 %v3323_v51  ;;  %3011 = vmatprep.subr.bf16.mxu0 %v3324_v52  ;;  %v2761_v52 = vld [vmem:[%s4178_s2] ss:$0 sm:$0xff] }
  0x32   : > { %3033 = vmatprep.subr.bf16.mxu1 %v3325_v53 }
  0x34   : > { %3012 = vmatpush3.bf16.msra.mxu0 %v3326_v54 }
  0x35   : > { %3034 = vmatpush3.bf16.msra.mxu1 %v3327_v55  ;;  %3013 = vmatprep.subr.bf16.mxu0 %v3328_v56 }
  0x36   : > { %3035 = vmatprep.subr.bf16.mxu1 %v3329_v57 }
  0x38   : > { %3014 = vmatpush3.bf16.msra.mxu0 %v3330_v58 }
  0x39   : > { %3036 = vmatpush3.bf16.msra.mxu1 %v3331_v59  ;;  %3015 = vmatprep.subr.bf16.mxu0 %v3332_v60 }
  0x3a   : > { %3037 = vmatprep.subr.bf16.mxu1 %v3333_v61 }
  0x3c   : > { %3016 = vmatpush3.bf16.msra.mxu0 %v3334_v62 }
  0x3d   : > { %3038 = vmatpush3.bf16.msra.mxu1 %v3335_v63  ;;  %3017 = vmatprep.subr.bf16.mxu0 %v3336_v0 }
  0x3e   : > { %3039 = vmatprep.subr.bf16.mxu1 %v3337_v1 }
  0x40   : > { %3018 = vmatpush3.bf16.msra.mxu0 %v3338_v2 }
  0x41   : > { %3040 = vmatpush3.bf16.msra.mxu1 %v3339_v3  ;;  %3019 = vmatprep.subr.bf16.mxu0 %v3340_v4 }
  0x42   : > { %3041 = vmatprep.subr.bf16.mxu1 %v3341_v5 }
  0x44   : > { %3020 = vmatpush3.bf16.msra.mxu0 %v3342_v6 }
  0x45   : > { %3042 = vmatpush3.bf16.msra.mxu1 %v3343_v7  ;;  %3049 = vmatprep.subr.bf16.mxu0 %v3344_v16 }
  0x46   : > { %3071 = vmatprep.subr.bf16.mxu1 %v3345_v17 }
  0x47   : > { %1066 = vmatmul.mubr.bf16.vlgmr.msra.gmra.mrb[4].mxu0 %v2766_v10  ;;  %v1121_v10 = vunpack.c.l.s4 %v3472_v9 }
  0x48   : > { %1107 = vmatmul.mubr.bf16.vlgmr.msra.gmra.mrb[4].mxu1 %v2768_v14  ;;  %3050 = vmatpush3.bf16.msra.mxu0 %v3346_v18 }
  0x49   : > { %3072 = vmatpush3.bf16.msra.mxu1 %v3347_v19  ;;  %3051 = vmatprep.subr.bf16.mxu0 %v3348_v20 }
  0x4a   : > { %3073 = vmatprep.subr.bf16.mxu1 %v3349_v21  ;;  %v1122_v21 = vunpack.c.0.s8 %v1121_v10 }
  0x4c   : > { %3052 = vmatpush3.bf16.msra.mxu0 %v3350_v22  ;;  %v1124_v22 = vshrl.u32 %v1123_v11, 7 }
  0x4d   : > { %3074 = vmatpush3.bf16.msra.mxu1 %v3351_v23  ;;  %3053 = vmatprep.subr.bf16.mxu0 %v3352_v24 }
  0x4e   : > { %3075 = vmatprep.subr.bf16.mxu1 %v3353_v25 }
  0x50   : > { %3054 = vmatpush3.bf16.msra.mxu0 %v3354_v26  ;;  %v1125_v26 = vsub.s32 %v1122_v21, %v1124_v22 }
  0x51   : > { %3076 = vmatpush3.bf16.msra.mxu1 %v3355_v27  ;;  %3055 = vmatprep.subr.bf16.mxu0 %v3356_v28 }
  0x52   : > { %3077 = vmatprep.subr.bf16.mxu1 %v3357_v29 }
  0x54   : > { %3056 = vmatpush3.bf16.msra.mxu0 %v3358_v30 }
  0x55   : > { %3078 = vmatpush3.bf16.msra.mxu1 %v3359_v31  ;;  %3057 = vmatprep.subr.bf16.mxu0 %v3360_v32  ;;  %v3473_v31 = vmov 1966171168  }
  0x56   : > { %3079 = vmatprep.subr.bf16.mxu1 %v3361_v33  ;;  %v1195_v32 = vunpack.c.l.s4 %v3473_v31 }
  0x58   : > { %3058 = vmatpush3.bf16.msra.mxu0 %v3362_v34 }
  0x59   : > { %3080 = vmatpush3.bf16.msra.mxu1 %v3363_v35  ;;  %3059 = vmatprep.subr.bf16.mxu0 %v3364_v36 }
  0x5a   : > { %3081 = vmatprep.subr.bf16.mxu1 %v3365_v37 }
  0x5c   : > { %3060 = vmatpush3.bf16.msra.mxu0 %v3366_v38 }
  0x5d   : > { %3082 = vmatpush3.bf16.msra.mxu1 %v3367_v39  ;;  %3061 = vmatprep.subr.bf16.mxu0 %v3368_v40 }
  0x5e   : > { %3083 = vmatprep.subr.bf16.mxu1 %v3369_v41 }
  0x60   : > { %3062 = vmatpush3.bf16.msra.mxu0 %v3370_v42 }
  0x61   : > { %3084 = vmatpush3.bf16.msra.mxu1 %v3371_v43  ;;  %3063 = vmatprep.subr.bf16.mxu0 %v3372_v44  ;;  %v1196_v44 = vunpack.c.0.s8 %v1195_v32 }
  0x62   : > { %3085 = vmatprep.subr.bf16.mxu1 %v3373_v45 }
  0x64   : > { %3064 = vmatpush3.bf16.msra.mxu0 %v3374_v46 }
  0x65   : > { %3086 = vmatpush3.bf16.msra.mxu1 %v3375_v47  ;;  %3093 = vmatprep.subr.bf16.mxu0 %v3376_v48 }
  0x66   : > { %3115 = vmatprep.subr.bf16.mxu1 %v3378_v49 }
  0xfa   : > { %v2977_v50 = vpop.f32.mrb[0].mxu0 }
  0xfb   : > { %v2999_v51 = vpop.f32.mrb[0].mxu1  ;;  %v2978_v53 = vpop.f32.mrb[1].mxu0 }
  0xfc   : > { %v2979_v54 = vadd.f32 %v2978_v53, %v2977_v50  ;;  %v3000_v55 = vpop.f32.mrb[1].mxu1  ;;  %v2980_v56 = vpop.f32.mrb[2].mxu0 }
  0xfd   : > { %v3001_v57 = vadd.f32 %v3000_v55, %v2999_v51  ;;  %v3002_v58 = vpop.f32.mrb[2].mxu1  ;;  %v2981_v59 = vpop.f32.mrb[3].mxu0 }
  0xfe   : > { %v986_v60 = vadd.f32 %v2979_v54, %v2761_v52  ;;  %v2982_v61 = vadd.f32 %v2981_v59, %v2980_v56  ;;  %v3003_v62 = vpop.f32.mrb[3].mxu1  ;;  %v1199_v56 = vsub.s32 %v1196_v44, %v1124_v22  ;;  %v3390_v44 = vld [vmem:[%s4181_s5 + $0xd8] sm:$0xff]  }
  0xff   : > { %v3004_v63 = vadd.f32 %v3003_v62, %v3002_v58 }
 0x100   : > { %v1027_v0 = vadd.f32 %v3001_v57, %v986_v60  ;;  %v989_v1 = vadd.f32 %v2982_v61, %v2761_v52 }
 0x102   : > { %v1030_v2 = vadd.f32 %v3004_v63, %v989_v1 }
 0x11a   : > { %v3021_v3 = vpop.f32.mrb[4].mxu0 }
 0x11b   : > { %v3043_v4 = vpop.f32.mrb[4].mxu1  ;;  %v3022_v5 = vpop.f32.mrb[5].mxu0 }
 0x11c   : > { %v3023_v6 = vadd.f32 %v3022_v5, %v3021_v3  ;;  %v3044_v7 = vpop.f32.mrb[5].mxu1  ;;  %v3024_v8 = vpop.f32.mrb[6].mxu0 }
 0x11d   : > { %v3045_v12 = vadd.f32 %v3044_v7, %v3043_v4  ;;  %v3046_v13 = vpop.f32.mrb[6].mxu1  ;;  %v3025_v14 = vpop.f32.mrb[7].mxu0 }
 0x11e   : > { %v1068_v15 = vadd.f32 %v3023_v6, %v1027_v0  ;;  %v3026_v16 = vadd.f32 %v3025_v14, %v3024_v8  ;;  %v3047_v17 = vpop.f32.mrb[7].mxu1 }
 0x11f   : > { %v3048_v18 = vadd.f32 %v3047_v17, %v3046_v13 }
 0x120   : > { %v1109_v19 = vadd.f32 %v3045_v12, %v1068_v15  ;;  %v1071_v20 = vadd.f32 %v3026_v16, %v1030_v2 }
 0x122   : > { %v1112_v23 = vadd.f32 %v3048_v18, %v1071_v20  ;;  %v1115_v24 = vmax.f32 %v1109_v19, 0.0 }
 0x124   : > { %v1116_v25 = vmax.f32 %v1112_v23, 0.0 }
 0x126   : > { %v1117_v27 = vpack.c.bf16 %v1116_v25, %v1115_v24  ;;  %v2834_v28 = vpack.c.bf16 %v1116_v25, %v1116_v25 }
 0x128   : > { %v1126_v29 = vrot.slane %v1117_v27, %v1125_v26  ;;  %v1133_v30 = vrot.slane %v2834_v28, %v1125_v26 }
 0x12a   : > { %v1134_v33 = vcombine.high %v1126_v29, %v1126_v29  ;;  %v1135_v34 = vcombine.high %v1133_v30, %v1133_v30  ;;  %v1142_v35 = vrot.slane %v1126_v29, %v1125_v26  ;;  %v1156_v36 = vrot.slane %v1133_v30, %v1125_v26 }
 0x12c   : > { %v1149_v37 = vrot.slane %v1134_v33, %v1125_v26  ;;  %v1160_v38 = vshll.u32 %v1142_v35, 16  ;;  %v1174_v39 = vshll.u32 %v1156_v36, 16  ;;  %v1184_v40 = vrot.slane %v1135_v34, %v1125_v26 }
 0x12d   : > { %v1158_v41 = vshrl.u32 %v1142_v35, 16  ;;  %v1172_v45 = vshrl.u32 %v1156_v36, 16  ;;  %v3380_v35 = vld [vmem:[%s4181_s5 + $0x48] sm:$0xff]  }
 0x12e   : > { %v1162_v42 = vrot.slane %v1160_v38, 1  ;;  %v1167_v43 = vshll.u32 %v1149_v37, 16  ;;  %v1176_v46 = vrot.slane %v1174_v39, 1  ;;  %v1188_v47 = vshll.u32 %v1184_v40, 16  ;;  %v3382_v36 = vld [vmem:[%s4181_s5 + $0xc8] sm:$0xff]   ;;  %v3384_v39 = vld [vmem:[%s4181_s5 + $0x50] sm:$0xff]  }
 0x12f   : > { %v1165_v49 = vshrl.u32 %v1149_v37, 16  ;;  %v1186_v52 = vshrl.u32 %v1184_v40, 16  ;;  %v3381_v37 = vld [vmem:[%s4181_s5 + $0x8] sm:$0xff]   ;;  %v3386_v40 = vld [vmem:[%s4181_s5 + $0xd0] sm:$0xff]  }
 0x130   : > { %v1163_v48 = vor.u32 %v1162_v42, %v1158_v41  ;;  %v1169_v50 = vrot.slane %v1167_v43, 1  ;;  %v1177_v51 = vor.u32 %v1176_v46, %v1172_v45  ;;  %v1190_v53 = vrot.slane %v1188_v47, 1  ;;  %v3383_v38 = vld [vmem:[%s4181_s5 + $0x88] sm:$0xff]   ;;  %v3385_v41 = vld [vmem:[%s4181_s5 + $0x10] sm:$0xff]   ;;  %v3388_v43 = vld [vmem:[%s4181_s5 + $0x58] sm:$0xff]  }
 0x131   : > { %v3387_v42 = vld [vmem:[%s4181_s5 + $0x90] sm:$0xff]   ;;  %v3389_v45 = vld [vmem:[%s4181_s5 + $0x18] sm:$0xff]   ;;  %v3392_v47 = vld [vmem:[%s4181_s5 + $0x60] sm:$0xff]  }
 0x132   : > { %v1170_v54 = vor.u32 %v1169_v50, %v1165_v49  ;;  %v1192_v55 = vcombine.low %v1126_v29, %v1163_v48  ;;  %v1191_v57 = vor.u32 %v1190_v53, %v1186_v52  ;;  %v1224_v58 = vcombine.low %v1133_v30, %v1177_v51  ;;  %v3391_v46 = vld [vmem:[%s4181_s5 + $0x98] sm:$0xff]   ;;  %v3393_v48 = vld [vmem:[%s4181_s5 + $0x20] sm:$0xff]   ;;  %v3396_v51 = vld [vmem:[%s4181_s5 + $0x68] sm:$0xff]  }
 0x133   : > { %v3394_v49 = vld [vmem:[%s4181_s5 + $0xe0] sm:$0xff]   ;;  %v3397_v52 = vld [vmem:[%s4181_s5 + $0x28] sm:$0xff]  }
 0x134   : > { %v1193_v59 = vcombine.low %v1134_v33, %v1170_v54  ;;  %v1248_v60 = vcombine.low %v1135_v34, %v1191_v57  ;;  %v1200_v61 = vrot.slane %v1192_v55, %v1199_v56  ;;  %v1231_v63 = vrot.slane %v1224_v58, %v1199_v56  ;;  %v3377_v33 = vld [vmem:[%s4181_s5] sm:$0xff]   ;;  %v3398_v53 = vld [vmem:[%s4181_s5 + $0xe8] sm:$0xff]   ;;  %v3400_v55 = vld [vmem:[%s4181_s5 + $0x70] sm:$0xff]  }
 0x135   : > { %v3379_v34 = vld [vmem:[%s4181_s5 + $0x80] sm:$0xff]   ;;  %v3399_v54 = vld [vmem:[%s4181_s5 + $0xa8] sm:$0xff]   ;;  %v3402_v57 = vld [vmem:[%s4181_s5 + $0xf0] sm:$0xff]  }
 0x136   : > { %v1207_v62 = vrot.slane %v1193_v59, %v1199_v56  ;;  %v1255_v0 = vrot.slane %v1248_v60, %v1199_v56  ;;  %v3395_v50 = vld [vmem:[%s4181_s5 + $0xa0] sm:$0xff]   ;;  %v3403_v58 = vld [vmem:[%s4181_s5 + $0xb0] sm:$0xff]   ;;  %v3404_v59 = vld [vmem:[%s4181_s5 + $0x78] sm:$0xff]  }
 0x137   : > { %v3405_v60 = vld [vmem:[%s4181_s5 + $0x38] sm:$0xff]  }
 0x138   : > { %v1208_v1 = vcombine.low %v1200_v61, %v1207_v62  ;;  %v1209_v2 = vcombine.high %v1200_v61, %v1207_v62  ;;  %v1232_v3 = vcombine.low %v1207_v62, %v1231_v63  ;;  %v1233_v4 = vcombine.high %v1207_v62, %v1231_v63  ;;  %v3406_v61 = vld [vmem:[%s4181_s5 + $0xf8] sm:$0xff]  }
 0x139   : > { %v1257_v5 = vcombine.high %v1231_v63, %v1255_v0  ;;  %v1256_v8 = vcombine.low %v1231_v63, %v1255_v0  ;;  %v3407_v62 = vld [vmem:[%s4181_s5 + $0xb8] sm:$0xff]   ;;  %v3408_v63 = vld [vmem:[%s4181_s5 + $0x140] sm:$0xff]  }
 0x13a   : > { %v1223_v6 = vrot.slane %v1209_v2, %v1199_v56  ;;  %v1240_v7 = vrot.slane %v1232_v3, %v1199_v56  ;;  %v1216_v10 = vrot.slane %v1208_v1, %v1199_v56  ;;  %v1247_v11 = vrot.slane %v1233_v4, %v1199_v56  ;;  %v3410_v0 = vld [vmem:[%s4181_s5 + $0x1c0] sm:$0xff]  }
 0x13b   : > { %v1271_v9 = vrot.slane %v1257_v5, %v1199_v56  ;;  %v1264_v15 = vrot.slane %v1256_v8, %v1199_v56  ;;  %v2835_v3 = vld [vmem:[%s4180_s4] ss:$0 sm:$0xff] }
 0x13c   : > { %v1276_v12 = vunpack.i.h.s16 %v1240_v7  ;;  %v2836_v13 = vpack.i.b16 %v1240_v7, %v1223_v6 }
 0x13d   : > { %v1280_v14 = vunpack.i.l.s16 %v1271_v9 }
 0x13e   : > { %v2837_v16 = vpack.i.b16 %v1247_v11, %v1276_v12  ;;  %v1357_v17 = vcombine.low %v1216_v10, %v2836_v13 }
 0x13f   : > { %v1379_v18 = vrot.slane %v1280_v14, %v1199_v56 }
 0x140   : > { %v1358_v19 = vcombine.low %v2837_v16, %v1264_v15  ;;  %v1365_v20 = vrot.slane %v1357_v17, %v1199_v56 }
 0x141   : > { %v1382_v22 = vcombine.high %v1379_v18, %v1379_v18  ;;  %v1403_v28 = vrot.slane %v1379_v18, %v1199_v56 }
 0x142   : > { %v1372_v21 = vrot.slane %v1358_v19, %v1199_v56 }
 0x143   : > { %v1410_v26 = vrot.slane %v1382_v22, %v1199_v56  ;;  %v3409_v22 = vld [vmem:[%s4181_s5 + $0x100] sm:$0xff]  }
 0x144   : > { %v1381_v23 = vcombine.high %v1365_v20, %v1372_v21  ;;  %v1380_v24 = vcombine.low %v1365_v20, %v1372_v21 }
 0x146   : > { %v1396_v25 = vrot.slane %v1381_v23, %v1199_v56  ;;  %v1389_v27 = vrot.slane %v1380_v24, %v1199_v56  ;;  %v3401_v56 = vld [vmem:[%s4181_s5 + $0x30] sm:$0xff]  }
 0x148   : > { %v1413_v29 = vcombine.low %v1396_v25, %v1410_v26  ;;  %v1414_v30 = vcombine.high %v1396_v25, %v1410_v26  ;;  %v1411_v31 = vcombine.low %v1389_v27, %v1403_v28  ;;  %v1412_v32 = vcombine.high %v1389_v27, %v1403_v28  ;;  %v3411_v25 = vld [vmem:[%s4181_s5 + $0x180] sm:$0xff]   ;;  %v3412_v26 = vld [vmem:[%s4181_s5 + $0x148] sm:$0xff]  }
 0x149   : > { %v3414_v28 = vld [vmem:[%s4181_s5 + $0x1c8] sm:$0xff]  }
 0x14a   : > { %1643 = vmatprep.mubr.bf16.mxu0 %v1413_v29  ;;  %1684 = vmatprep.mubr.bf16.mxu1 %v1414_v30  ;;  %v3413_v29 = vld [vmem:[%s4181_s5 + $0x108] sm:$0xff]  }
 0x14b   : > { %1644 = vmatmul.mubr.bf16.vlgmr.msra.gmra.mrb[8].mxu0 %v1411_v31  ;;  %1685 = vmatmul.mubr.bf16.vlgmr.msra.gmra.mrb[8].mxu1 %v1412_v32  ;;  %v3416_v31 = vld [vmem:[%s4181_s5 + $0x150] sm:$0xff]   ;;  %v3415_v32 = vld [vmem:[%s4181_s5 + $0x188] sm:$0xff]  }
 0x14c   : > { %3094 = vmatpush3.bf16.msra.mxu0 %v3377_v33  ;;  %3116 = vmatpush3.bf16.msra.mxu1 %v3379_v34  ;;  %v3418_v33 = vld [vmem:[%s4181_s5 + $0x1d0] sm:$0xff]  }
 0x14d   : > { %3095 = vmatprep.subr.bf16.mxu0 %v3380_v35  ;;  %3117 = vmatprep.subr.bf16.mxu1 %v3382_v36  ;;  %v3417_v34 = vld [vmem:[%s4181_s5 + $0x110] sm:$0xff]   ;;  %v3420_v35 = vld [vmem:[%s4181_s5 + $0x158] sm:$0xff]  }
 0x14e   : > { %v3419_v36 = vld [vmem:[%s4181_s5 + $0x190] sm:$0xff]  }
 0x150   : > { %3096 = vmatpush3.bf16.msra.mxu0 %v3381_v37  ;;  %3118 = vmatpush3.bf16.msra.mxu1 %v3383_v38  ;;  %v3422_v37 = vld [vmem:[%s4181_s5 + $0x1d8] sm:$0xff]  }
 0x151   : > { %3097 = vmatprep.subr.bf16.mxu0 %v3384_v39  ;;  %3119 = vmatprep.subr.bf16.mxu1 %v3386_v40  ;;  %v3421_v38 = vld [vmem:[%s4181_s5 + $0x118] sm:$0xff]   ;;  %v3424_v39 = vld [vmem:[%s4181_s5 + $0x160] sm:$0xff]  }
 0x152   : > { %v3423_v40 = vld [vmem:[%s4181_s5 + $0x198] sm:$0xff]  }
 0x154   : > { %3098 = vmatpush3.bf16.msra.mxu0 %v3385_v41  ;;  %3120 = vmatpush3.bf16.msra.mxu1 %v3387_v42  ;;  %v3426_v41 = vld [vmem:[%s4181_s5 + $0x1e0] sm:$0xff]  }
 0x155   : > { %3099 = vmatprep.subr.bf16.mxu0 %v3388_v43  ;;  %3121 = vmatprep.subr.bf16.mxu1 %v3390_v44  ;;  %v3425_v42 = vld [vmem:[%s4181_s5 + $0x120] sm:$0xff]   ;;  %v3428_v43 = vld [vmem:[%s4181_s5 + $0x168] sm:$0xff]  }
 0x156   : > { %v3427_v44 = vld [vmem:[%s4181_s5 + $0x1a0] sm:$0xff]  }
 0x158   : > { %3100 = vmatpush3.bf16.msra.mxu0 %v3389_v45  ;;  %3122 = vmatpush3.bf16.msra.mxu1 %v3391_v46  ;;  %v3430_v45 = vld [vmem:[%s4181_s5 + $0x1e8] sm:$0xff]  }
 0x159   : > { %3101 = vmatprep.subr.bf16.mxu0 %v3392_v47  ;;  %3123 = vmatprep.subr.bf16.mxu1 %v3394_v49  ;;  %v3429_v46 = vld [vmem:[%s4181_s5 + $0x128] sm:$0xff]   ;;  %v3432_v47 = vld [vmem:[%s4181_s5 + $0x170] sm:$0xff]  }
 0x15a   : > { %v3434_v49 = vld [vmem:[%s4181_s5 + $0x1f0] sm:$0xff]  }
 0x15c   : > { %3102 = vmatpush3.bf16.msra.mxu0 %v3393_v48  ;;  %3124 = vmatpush3.bf16.msra.mxu1 %v3395_v50  ;;  %v3431_v48 = vld [vmem:[%s4181_s5 + $0x1a8] sm:$0xff]   ;;  %v3433_v50 = vld [vmem:[%s4181_s5 + $0x130] sm:$0xff]  }
 0x15d   : > { %3103 = vmatprep.subr.bf16.mxu0 %v3396_v51  ;;  %3125 = vmatprep.subr.bf16.mxu1 %v3398_v53  ;;  %v3436_v51 = vld [vmem:[%s4181_s5 + $0x178] sm:$0xff]  }
 0x15e   : > { %v3438_v53 = vld [vmem:[%s4181_s5 + $0x1f8] sm:$0xff]  }
 0x160   : > { %3104 = vmatpush3.bf16.msra.mxu0 %v3397_v52  ;;  %3126 = vmatpush3.bf16.msra.mxu1 %v3399_v54  ;;  %v3435_v52 = vld [vmem:[%s4181_s5 + $0x1b0] sm:$0xff]   ;;  %v3437_v54 = vld [vmem:[%s4181_s5 + $0x138] sm:$0xff]  }
 0x161   : > { %3105 = vmatprep.subr.bf16.mxu0 %v3400_v55  ;;  %3127 = vmatprep.subr.bf16.mxu1 %v3402_v57  ;;  %v3439_v55 = vld [vmem:[%s4181_s5 + $0x1b8] sm:$0xff]  }
 0x164   : > { %3106 = vmatpush3.bf16.msra.mxu0 %v3401_v56  ;;  %3128 = vmatpush3.bf16.msra.mxu1 %v3403_v58  ;;  %v3440_v56 = vld [vmem:[%s4181_s5 + $0x200] sm:$0xff]   ;;  %v3474_v58 = vmov 0.0  }
 0x165   : > { %3107 = vmatprep.subr.bf16.mxu0 %v3404_v59  ;;  %3129 = vmatprep.subr.bf16.mxu1 %v3406_v61  ;;  %v3442_v61 = vld [vmem:[%s4181_s5 + $0x210] sm:$0xff]  }
 0x168   : > { %3108 = vmatpush3.bf16.msra.mxu0 %v3405_v60  ;;  %3130 = vmatpush3.bf16.msra.mxu1 %v3407_v62  ;;  %v3441_v60 = vld [vmem:[%s4181_s5 + $0x208] sm:$0xff]   ;;  %v3443_v62 = vld [vmem:[%s4181_s5 + $0x218] sm:$0xff]  }
 0x169   : > { %3137 = vmatprep.subr.bf16.mxu0 %v3408_v63  ;;  %3159 = vmatprep.subr.bf16.mxu1 %v3410_v0  ;;  %v3444_v63 = vld [vmem:[%s4181_s5 + $0x220] sm:$0xff]   ;;  %v3445_v0 = vld [vmem:[%s4181_s5 + $0x228] sm:$0xff]  }
 0x21e   : > { %v3065_v1 = vpop.f32.mrb[8].mxu0  ;;  %v3087_v2 = vpop.f32.mrb[8].mxu1 }
 0x21f   : > { %v3066_v4 = vpop.f32.mrb[9].mxu0  ;;  %v3088_v5 = vpop.f32.mrb[9].mxu1 }
 0x220   : > { %v3067_v6 = vadd.f32 %v3066_v4, %v3065_v1  ;;  %v3089_v7 = vadd.f32 %v3088_v5, %v3087_v2  ;;  %v3068_v8 = vpop.f32.mrb[10].mxu0  ;;  %v3090_v9 = vpop.f32.mrb[10].mxu1  ;;  %v3446_v1 = vld [vmem:[%s4181_s5 + $0x230] sm:$0xff]   ;;  %v3447_v2 = vld [vmem:[%s4181_s5 + $0x238] sm:$0xff]   ;;  %v3448_v4 = vld [vmem:[%s4183_s7] sm:$0xff]  }
 0x221   : > { %v3069_v10 = vpop.f32.mrb[11].mxu0  ;;  %v3091_v11 = vpop.f32.mrb[11].mxu1  ;;  %v3449_v5 = vld [vmem:[%s4183_s7 + $0x8] sm:$0xff]  }
 0x222   : > { %v1646_v12 = vadd.f32 %v3067_v6, %v2835_v3  ;;  %v3070_v13 = vadd.f32 %v3069_v10, %v3068_v8  ;;  %v3092_v14 = vadd.f32 %v3091_v11, %v3090_v9  ;;  %v3450_v6 = vld [vmem:[%s4183_s7 + $0x10] sm:$0xff]   ;;  %v3452_v8 = vld [vmem:[%s4183_s7 + $0x20] sm:$0xff]   ;;  %v3453_v9 = vld [vmem:[%s4183_s7 + $0x28] sm:$0xff]  }
 0x223   : > { %v3454_v10 = vld [vmem:[%s4183_s7 + $0x30] sm:$0xff]   ;;  %v3455_v11 = vld [vmem:[%s4183_s7 + $0x38] sm:$0xff]  }
 0x224   : > { %v1687_v15 = vadd.f32 %v3089_v7, %v1646_v12  ;;  %v1649_v16 = vadd.f32 %v3070_v13, %v2835_v3  ;;  %v3451_v7 = vld [vmem:[%s4183_s7 + $0x18] sm:$0xff]   ;;  %v3456_v12 = vld [vmem:[%s4185_s9] sm:$0xff]   ;;  %v3457_v13 = vld [vmem:[%s4185_s9 + $0x8] sm:$0xff]  }
 0x226   : > { %v1690_v17 = vadd.f32 %v3092_v14, %v1649_v16  ;;  %v1693_v18 = vmax.f32 %v1687_v15, 0.0  ;;  %v3458_v14 = vld [vmem:[%s4185_s9 + $0x10] sm:$0xff]   ;;  %v3459_v15 = vld [vmem:[%s4185_s9 + $0x18] sm:$0xff]   ;;  %v3460_v16 = vld [vmem:[%s4185_s9 + $0x20] sm:$0xff]  }
 0x228   : > { %v1694_v19 = vmax.f32 %v1690_v17, 0.0  ;;  %v3461_v17 = vld [vmem:[%s4185_s9 + $0x28] sm:$0xff]  }
 0x22a   : > { %v3960_v20 = vpack.c.bf16 %v1694_v19, %v1693_v18  ;;  %v1859_v19 = vld [vmem:[%s4182_s6] sm:$0x1] }
 0x22c   : > { %v1697_v21 = vshrl.u32 %v3960_v20, 16  ;;  %v1701_v27 = vrot.slane %v3960_v20, 1  ;;  %v1705_v57 = vrot.slane %v3960_v20, 2  ;;  %v1709_v59 = vrot.slane %v3960_v20, 3 }
 0x22d   : > { %v1713_v3 = vrot.slane %v3960_v20, 4 }
 0x22e   : > { %2324 = vmatprep.mubr.bf16.mxu0 %v1697_v21  ;;  %v1703_v23 = vrot.slane %v1697_v21, 1  ;;  %v1707_v24 = vrot.slane %v1697_v21, 2  ;;  %v1711_v30 = vrot.slane %v1697_v21, 3 }
 0x22f   : > { %2325 = vmatmul.mubr.bf16.vlgmr.msra.gmra.mrb[12].mxu0 %v3960_v20 }
 0x230   : > { %3138 = vmatpush3.bf16.msra.mxu0 %v3409_v22  ;;  %2364 = vmatprep.mubr.bf16.mxu1 %v1703_v23 }
 0x231   : > { %2404 = vmatprep.mubr.bf16.mxu0 %v1707_v24  ;;  %2365 = vmatmul.mubr.bf16.vlgmr.msra.gmra.mrb[12].mxu1 %v1701_v27 }
 0x232   : > { %3160 = vmatpush3.bf16.msra.mxu1 %v3411_v25  ;;  %3139 = vmatprep.subr.bf16.mxu0 %v3412_v26 }
 0x233   : > { %2444 = vmatprep.mubr.bf16.mxu1 %v1711_v30  ;;  %3161 = vmatprep.subr.bf16.mxu1 %v3414_v28 }
 0x234   : > { %3140 = vmatpush3.bf16.msra.mxu0 %v3413_v29 }
 0x235   : > { %3141 = vmatprep.subr.bf16.mxu0 %v3416_v31 }
 0x236   : > { %3162 = vmatpush3.bf16.msra.mxu1 %v3415_v32 }
 0x237   : > { %3163 = vmatprep.subr.bf16.mxu1 %v3418_v33 }
 0x238   : > { %3142 = vmatpush3.bf16.msra.mxu0 %v3417_v34 }
 0x239   : > { %3143 = vmatprep.subr.bf16.mxu0 %v3420_v35 }
 0x23a   : > { %3164 = vmatpush3.bf16.msra.mxu1 %v3419_v36 }
 0x23b   : > { %3165 = vmatprep.subr.bf16.mxu1 %v3422_v37 }
 0x23c   : > { %3144 = vmatpush3.bf16.msra.mxu0 %v3421_v38 }
 0x23d   : > { %3145 = vmatprep.subr.bf16.mxu0 %v3424_v39 }
 0x23e   : > { %3166 = vmatpush3.bf16.msra.mxu1 %v3423_v40 }
 0x23f   : > { %3167 = vmatprep.subr.bf16.mxu1 %v3426_v41 }
 0x240   : > { %3146 = vmatpush3.bf16.msra.mxu0 %v3425_v42 }
 0x241   : > { %3147 = vmatprep.subr.bf16.mxu0 %v3428_v43 }
 0x242   : > { %3168 = vmatpush3.bf16.msra.mxu1 %v3427_v44 }
 0x243   : > { %3169 = vmatprep.subr.bf16.mxu1 %v3430_v45 }
 0x244   : > { %3148 = vmatpush3.bf16.msra.mxu0 %v3429_v46 }
 0x245   : > { %3149 = vmatprep.subr.bf16.mxu0 %v3432_v47 }
 0x246   : > { %3170 = vmatpush3.bf16.msra.mxu1 %v3431_v48 }
 0x247   : > { %3171 = vmatprep.subr.bf16.mxu1 %v3434_v49 }
 0x248   : > { %3150 = vmatpush3.bf16.msra.mxu0 %v3433_v50  ;;  %v3462_v50 = vld [vmem:[%s4185_s9 + $0x30] sm:$0xff]  }
 0x249   : > { %3151 = vmatprep.subr.bf16.mxu0 %v3436_v51  ;;  %v3463_v51 = vld [vmem:[%s4185_s9 + $0x38] sm:$0xff]  }
 0x24a   : > { %3172 = vmatpush3.bf16.msra.mxu1 %v3435_v52  ;;  %v2510_v52 = vld [vmem:[%s4184_s8] sm:$0x1] }
 0x24b   : > { %3173 = vmatprep.subr.bf16.mxu1 %v3438_v53 }
 0x24c   : > { %3152 = vmatpush3.bf16.msra.mxu0 %v3437_v54 }
 0x24d   : > { %3208 = vmatprep.subr.bf16.mxu0 %v3474_v58 }
 0x24e   : > { %3174 = vmatpush3.bf16.msra.mxu1 %v3439_v55 }
 0x24f   : > { %2405 = vmatmul.mubr.bf16.vlgmr.msra.gmra.mrb[16].mxu0 %v1705_v57  ;;  %3228 = vmatprep.subr.bf16.mxu1 %v3474_v58 }
 0x250   : > { %3209 = vmatpush3.bf16.msra.mxu0 %v3440_v56  ;;  %3224 = vmatprep.mubr.msk.bf16.mxu0 %vm3475_vm0, %v3474_v58 }
 0x251   : > { %2445 = vmatmul.mubr.bf16.vlgmr.msra.gmra.mrb[16].mxu1 %v1709_v59  ;;  %3210 = vmatprep.subr.bf16.mxu0 %v3474_v58 }
 0x252   : > { %3244 = vmatprep.mubr.msk.bf16.mxu1 %vm3475_vm0, %v3474_v58  ;;  %3229 = vmatpush3.bf16.msra.mxu1 %v3448_v4 }
 0x253   : > { %3230 = vmatprep.subr.bf16.mxu1 %v3474_v58 }
 0x254   : > { %3211 = vmatpush3.bf16.msra.mxu0 %v3441_v60 }
 0x255   : > { %3212 = vmatprep.subr.bf16.mxu0 %v3474_v58 }
 0x256   : > { %3231 = vmatpush3.bf16.msra.mxu1 %v3449_v5 }
 0x257   : > { %3232 = vmatprep.subr.bf16.mxu1 %v3474_v58 }
 0x258   : > { %3213 = vmatpush3.bf16.msra.mxu0 %v3442_v61 }
 0x259   : > { %3214 = vmatprep.subr.bf16.mxu0 %v3474_v58 }
 0x25a   : > { %3233 = vmatpush3.bf16.msra.mxu1 %v3450_v6 }
 0x25b   : > { %3234 = vmatprep.subr.bf16.mxu1 %v3474_v58 }
 0x25c   : > { %3215 = vmatpush3.bf16.msra.mxu0 %v3443_v62 }
 0x25d   : > { %3216 = vmatprep.subr.bf16.mxu0 %v3474_v58 }
 0x25e   : > { %3235 = vmatpush3.bf16.msra.mxu1 %v3451_v7 }
 0x25f   : > { %3236 = vmatprep.subr.bf16.mxu1 %v3474_v58 }
 0x260   : > { %3217 = vmatpush3.bf16.msra.mxu0 %v3444_v63 }
 0x261   : > { %3218 = vmatprep.subr.bf16.mxu0 %v3474_v58 }
 0x262   : > { %3237 = vmatpush3.bf16.msra.mxu1 %v3452_v8 }
 0x263   : > { %3238 = vmatprep.subr.bf16.mxu1 %v3474_v58 }
 0x264   : > { %3219 = vmatpush3.bf16.msra.mxu0 %v3445_v0 }
 0x265   : > { %3220 = vmatprep.subr.bf16.mxu0 %v3474_v58 }
 0x266   : > { %3239 = vmatpush3.bf16.msra.mxu1 %v3453_v9 }
 0x267   : > { %3240 = vmatprep.subr.bf16.mxu1 %v3474_v58 }
 0x268   : > { %3221 = vmatpush3.bf16.msra.mxu0 %v3446_v1 }
 0x269   : > { %3222 = vmatprep.subr.bf16.mxu0 %v3474_v58 }
 0x26a   : > { %3241 = vmatpush3.bf16.msra.mxu1 %v3454_v10 }
 0x26b   : > { %3242 = vmatprep.subr.bf16.mxu1 %v3474_v58 }
 0x26c   : > { %3223 = vmatpush3.bf16.msra.mxu0 %v3447_v2 }
 0x26d   : > { %3248 = vmatprep.subr.bf16.mxu0 %v3474_v58 }
 0x26e   : > { %3243 = vmatpush3.bf16.msra.mxu1 %v3455_v11 }
 0x26f   : > { %3225 = vmatmul.mubr.bf16.vlgmr.msra.gmra.mrb[20].mxu0 %v1713_v3 }
 0x270   : > { %3264 = vmatprep.mubr.msk.bf16.mxu0 %vm3475_vm0, %v3474_v58  ;;  %3249 = vmatpush3.bf16.msra.mxu0 %v3456_v12 }
 0x271   : > { %3250 = vmatprep.subr.bf16.mxu0 %v3474_v58 }
 0x274   : > { %3251 = vmatpush3.bf16.msra.mxu0 %v3457_v13 }
 0x275   : > { %3252 = vmatprep.subr.bf16.mxu0 %v3474_v58 }
 0x278   : > { %3253 = vmatpush3.bf16.msra.mxu0 %v3458_v14 }
 0x279   : > { %3254 = vmatprep.subr.bf16.mxu0 %v3474_v58 }
 0x27c   : > { %3255 = vmatpush3.bf16.msra.mxu0 %v3459_v15 }
 0x27d   : > { %3256 = vmatprep.subr.bf16.mxu0 %v3474_v58 }
 0x280   : > { %3257 = vmatpush3.bf16.msra.mxu0 %v3460_v16 }
 0x281   : > { %3258 = vmatprep.subr.bf16.mxu0 %v3474_v58 }
 0x284   : > { %3259 = vmatpush3.bf16.msra.mxu0 %v3461_v17 }
 0x285   : > { %3260 = vmatprep.subr.bf16.mxu0 %v3474_v58 }
 0x288   : > { %3261 = vmatpush3.bf16.msra.mxu0 %v3462_v50 }
 0x289   : > { %3262 = vmatprep.subr.bf16.mxu0 %v3474_v58  ;;  %v2617_v58 = vld [vmem:[%s4186_s10] sm:$0x1] }
 0x28c   : > { %3263 = vmatpush3.bf16.msra.mxu0 %v3463_v51 }
 0x302   : > { %v3109_v18 = vpop.f32.mrb[12].mxu0 }
 0x303   : > { %v3110_v20 = vpop.f32.mrb[13].mxu0 }
 0x304   : > { %v3111_v21 = vadd.f32 %v3110_v20, %v3109_v18  ;;  %v3112_v22 = vpop.f32.mrb[14].mxu0  ;;  %v3131_v23 = vpop.f32.mrb[12].mxu1 }
 0x305   : > { %v3113_v24 = vpop.f32.mrb[15].mxu0  ;;  %v3132_v25 = vpop.f32.mrb[13].mxu1 }
 0x306   : > { %v2327_v26 = vadd.f32 %v3111_v21, %v1859_v19  ;;  %v3133_v27 = vadd.f32 %v3132_v25, %v3131_v23  ;;  %v3134_v28 = vpop.f32.mrb[14].mxu1 }
 0x307   : > { %v3135_v29 = vpop.f32.mrb[15].mxu1 }
 0x308   : > { %v2367_v30 = vadd.f32 %v3133_v27, %v2327_v26 }
 0x322   : > { %v3153_v31 = vpop.f32.mrb[16].mxu0 }
 0x323   : > { %v3154_v32 = vpop.f32.mrb[17].mxu0 }
 0x324   : > { %v3155_v33 = vadd.f32 %v3154_v32, %v3153_v31  ;;  %v3156_v34 = vpop.f32.mrb[18].mxu0  ;;  %v3175_v35 = vpop.f32.mrb[16].mxu1 }
 0x325   : > { %v3157_v36 = vpop.f32.mrb[19].mxu0  ;;  %v3176_v37 = vpop.f32.mrb[17].mxu1 }
 0x326   : > { %v2407_v38 = vadd.f32 %v3155_v33, %v2367_v30  ;;  %v3177_v39 = vadd.f32 %v3176_v37, %v3175_v35  ;;  %v3178_v40 = vpop.f32.mrb[18].mxu1 }
 0x327   : > { %v3179_v41 = vpop.f32.mrb[19].mxu1 }
 0x328   : > { %v2447_v42 = vadd.f32 %v3177_v39, %v2407_v38 }
 0x342   : > { %v2486_v43 = vpop.f32.mrb[20].mxu0 }
 0x343   : > { %v2487_v44 = vadd.f32 %v2486_v43, %v2447_v42  ;;  %v3226_v45 = vpop.f32.mrb[21].mxu0 }
 0x344   : > { %v2489_v46 = vpop.f32.mrb[22].mxu0 }
 0x345   : > { %v2492_v47 = vmax.f32 %v2487_v44, 0.0  ;;  %v3227_v48 = vpop.f32.mrb[23].mxu0 }
 0x347   : > { %v2493_v49 = vpack.c.bf16 %v2492_v47, %v2492_v47 }
 0x349   : > { %3245 = vmatmul.mubr.bf16.vlgmr.msra.gmra.mrb[20].mxu1 %v2493_v49 }
 0x41c   : > { %v2593_v53 = vpop.f32.mrb[20].mxu1 }
 0x41d   : > { %v2594_v54 = vadd.f32 %v2593_v53, %v2510_v52  ;;  %v3246_v55 = vpop.f32.mrb[21].mxu1 }
 0x41e   : > { %v2596_v56 = vpop.f32.mrb[22].mxu1 }
 0x41f   : > { %v2599_v57 = vmax.f32 %v2594_v54, 0.0  ;;  %v3247_v59 = vpop.f32.mrb[23].mxu1 }
 0x421   : > { %v2600_v60 = vpack.c.bf16 %v2599_v57, %v2599_v57 }
 0x423   : > { %3265 = vmatmul.mubr.bf16.vlgmr.msra.gmra.mrb[24].mxu0 %v2600_v60 }
 0x4f6   : > { %v2700_v61 = vpop.f32.mrb[24].mxu0 }
 0x4f7   : > { %v2701_v62 = vadd.f32 %v2700_v61, %v2617_v58  ;;  %v3266_v63 = vpop.f32.mrb[25].mxu0 }
 0x4f8   : > { %v2703_v0 = vpop.f32.mrb[26].mxu0 }
 0x4f9   : > { %2706 = vst [vmem:[%s382_s14] sm:$0x1] %v2701_v62  ;;  %v3267_v1 = vpop.f32.mrb[27].mxu0 }
 0x4fa PF: > { %s21_s17 = sadd.s32 1, %s3470_s17  }
 0x4fb   : > { %p18_p4 = scmp.ge.s32.totalorder %s21_s17, 4  }
 0x4fd   :  { %20 = sbr.rel (!%p18_p4) target bundleno = 1 (0x1), region = 94 }

</bundles_post_ra>
